<compile_context>
chip_gen: v7x
topology: tpu7x:2x2x1
jax: 0.10.0
libtpu: 0.0.40
codegen_flags: <defaults>
</compile_context>

<pallas_src>
import functools

import numpy as np
import jax
import jax.numpy as jnp
from jax.experimental import pallas as pl
from jax.experimental.pallas import tpu as pltpu  # noqa: F401  (no scratch needed anymore)


# ------------------------------ Pallas kernel -------------------------------

def _fused_kernel(x_ref, w_ref, gamma_ref, beta_ref, o_ref, *,
                  kernel_size, stride, padding, nbatch, lin, lout, lpad,
                  eps, inv_count):
    """Fused ConvTranspose1d + BatchNorm1d(training stats) + ReLU.

    x_ref:      (Cin, N*Lin)    flattened batch, lanes = length
    w_ref:      (K, Cout, Cin)  w_ref[k] = w[:, :, k].T
    gamma/beta: (Cout, 1)
    o_ref:      (Cout, Lpad)    lane-dense output slab, Lpad = 128*ceil(N*Lout/128)
    """
    nlin = nbatch * lin
    nlout = nbatch * lout
    x = x_ref[...]                                            # (Cin, N*Lin)

    # In-kernel one-hot scatter (no HBM operand, no host-side build):
    #   S_k[r, c] = 1 iff r and c lie in the same batch block n and
    #               (r - n*Lin)*stride - padding + k == (c - n*Lout)
    # which reduces to  r*stride - c == n*(Lin*stride - Lout) + padding - k.
    row = jax.lax.broadcasted_iota(jnp.int32, (nlin, lpad), 0)
    col = jax.lax.broadcasted_iota(jnp.int32, (nlin, lpad), 1)
    diff = row * stride - col
    blocks = []
    for n in range(nbatch):                                   # static, small N
        in_block = ((row >= n * lin) & (row < (n + 1) * lin) &
                    (col >= n * lout) & (col < (n + 1) * lout))
        blocks.append((in_block, n * (lin * stride - lout) + padding))

    hi = jax.lax.Precision.HIGHEST
    y = jnp.zeros((o_ref.shape[0], lpad), jnp.float32)        # lives in vregs
    for k in range(kernel_size):                              # static, small K
        cond = blocks[0][0] & (diff == blocks[0][1] - k)
        for in_block, c0 in blocks[1:]:
            cond = cond | (in_block & (diff == c0 - k))
        s_k = jnp.where(cond, 1.0, 0.0)                       # (N*Lin, Lpad) one-hot
        m_k = jnp.dot(w_ref[k], x, precision=hi,
                      preferred_element_type=jnp.float32)     # (Cout, N*Lin)
        y = y + jnp.dot(m_k, s_k, precision=hi,
                        preferred_element_type=jnp.float32)   # (Cout, Lpad)
    # (ConvTranspose bias omitted: it cancels exactly under training-mode BN.)

    # Training-mode BatchNorm1d over the N*Lout valid columns (padded columns are 0,
    # so the sums are unchanged); centered two-pass variance (biased, like PyTorch).
    mean = jnp.sum(y, axis=1, keepdims=True) * inv_count
    lane = jax.lax.broadcasted_iota(jnp.int32, y.shape, 1)
    yc = jnp.where(lane < nlout, y - mean, 0.0)
    var = jnp.sum(yc * yc, axis=1, keepdims=True) * inv_count
    y_hat = yc * jax.lax.rsqrt(var + eps)

    # Scale/shift + ReLU straight to the lane-dense (unmasked-store) output slab.
    o_ref[...] = jnp.maximum(y_hat * gamma_ref[...] + beta_ref[...], 0.0)


# ------------------------------- wrapper -------------------------------------

@functools.partial(jax.jit,
                   static_argnames=("stride", "padding", "output_padding", "eps"))
def conv1d_transpose_bn_relu(x, w, b, gamma, beta, *, stride, padding,
                             output_padding, eps=1e-5):
    """x: (N, Cin, Lin) f32, w: (Cin, Cout, K) (PyTorch layout), b: (Cout,)."""
    n, cin, lin = x.shape
    _, cout, k = w.shape
    lout = (lin - 1) * stride - 2 * padding + k + output_padding
    nlout = n * lout
    lpad = 128 * pl.cdiv(nlout, 128)           # lane-dense output slab width

    # Layout plumbing only (fused under jit): lane-dense operands for the kernel.
    x2 = jnp.transpose(x, (1, 0, 2)).reshape(cin, n * lin)    # (Cin, N*Lin)
    wk = jnp.transpose(w, (2, 1, 0))                          # (K, Cout, Cin)

    # Bias is a per-channel constant added before training-mode BatchNorm:
    # the BN mean absorbs it and the variance is unchanged -> exact no-op.
    del b

    out2 = pl.pallas_call(
        functools.partial(_fused_kernel, kernel_size=k, stride=stride,
                          padding=padding, nbatch=n, lin=lin, lout=lout,
                          lpad=lpad, eps=float(eps),
                          inv_count=1.0 / float(nlout)),
        out_shape=jax.ShapeDtypeStruct((cout, lpad), jnp.float32),
    )(x2, wk, gamma.reshape(cout, 1), beta.reshape(cout, 1))

    # Slice off the padded lanes and restore NCL.
    return jnp.transpose(out2[:, :nlout].reshape(cout, n, lout), (1, 0, 2))


# ------------------------------ reference ------------------------------------

def _reference(x, w, b, gamma, beta, stride, padding, output_padding, eps):
    x, w, b = np.asarray(x, np.float64), np.asarray(w, np.float64), np.asarray(b, np.float64)
    gamma, beta = np.asarray(gamma, np.float64), np.asarray(beta, np.float64)
    n, cin, lin = x.shape
    _, cout, k = w.shape
    lout = (lin - 1) * stride - 2 * padding + k + output_padding
    y = np.zeros((n, cout, lout), np.float64)
    for ni in range(n):
        for t in range(lin):
            for kk in range(k):
                l = t * stride - padding + kk
                if 0 <= l < lout:
                    y[ni, :, l] += w[:, :, kk].T @ x[ni, :, t]
    y += b[None, :, None]
    mean = y.mean(axis=(0, 2), keepdims=True)
    var = y.var(axis=(0, 2), keepdims=True)        # biased, as PyTorch BN uses
    y_hat = (y - mean) / np.sqrt(var + eps)
    return np.maximum(gamma[None, :, None] * y_hat + beta[None, :, None], 0.0)


# --------------------------------- main ---------------------------------------

if __name__ == "__main__":
    # Module hyperparameters (cin, cout, kernel_size, stride, padding=1, output_padding=1)
    CIN, COUT, K, STRIDE, PAD, OUT_PAD = 4, 6, 4, 2, 1, 1
    N, LIN = 2, 16

    key = jax.random.PRNGKey(0)
    kx, kw, kb, kg, kbeta = jax.random.split(key, 5)

    x = jax.random.normal(kx, (N, CIN, LIN), jnp.float32)
    # ConvTranspose1d weight layout: (Cin, Cout, K); deterministic init.
    bound = 1.0 / np.sqrt(CIN * K)
    w = jax.random.uniform(kw, (CIN, COUT, K), jnp.float32, -bound, bound)
    b = jax.random.uniform(kb, (COUT,), jnp.float32, -bound, bound)
    gamma = 1.0 + 0.1 * jax.random.normal(kg, (COUT,), jnp.float32)
    beta = 0.1 * jax.random.normal(kbeta, (COUT,), jnp.float32)

    out = conv1d_transpose_bn_relu(
        x, w, b, gamma, beta,
        stride=STRIDE, padding=PAD, output_padding=OUT_PAD)
    out = jax.block_until_ready(out)

    ref = _reference(x, w, b, gamma, beta, STRIDE, PAD, OUT_PAD, eps=1e-5)
    np.testing.assert_allclose(np.asarray(out), ref, rtol=1e-3, atol=1e-3)

    print("KERNEL_OK")
</pallas_src>

<mosaic_0001>
module attributes {stable_mosaic.version = 11 : i64} {
  func.func @_fused_kernel(%arg0: memref<4x32xf32, #tpu.memory_space<vmem>>, %arg1: memref<4x6x4xf32, #tpu.memory_space<vmem>>, %arg2: memref<6x1xf32, #tpu.memory_space<vmem>>, %arg3: memref<6x1xf32, #tpu.memory_space<vmem>>, %arg4: memref<6x128xf32, #tpu.memory_space<vmem>>) attributes {dimension_semantics = [], scalar_prefetch = 0 : i64, scratch_operands = 0 : i64, tpu.core_type = #tpu.core_type<tc>} {
    %c0 = arith.constant 0 : index
    %c0_0 = arith.constant 0 : index
    %0 = vector.load %arg0[%c0, %c0_0] : memref<4x32xf32, #tpu.memory_space<vmem>>, vector<4x32xf32>
    %1 = tpu.iota {dimensions = array<i32: 0>} : vector<32x128xi32>
    %2 = tpu.iota {dimensions = array<i32: 1>} : vector<32x128xi32>
    %c2_i32 = arith.constant 2 : i32
    %3 = vector.broadcast %c2_i32 : i32 to vector<32x128xi32>
    %4 = arith.muli %1, %3 : vector<32x128xi32>
    %5 = arith.subi %4, %2 : vector<32x128xi32>
    %c0_i32 = arith.constant 0 : i32
    %6 = vector.broadcast %c0_i32 : i32 to vector<32x128xi32>
    %7 = arith.cmpi sge, %1, %6 : vector<32x128xi32>
    %c16_i32 = arith.constant 16 : i32
    %8 = vector.broadcast %c16_i32 : i32 to vector<32x128xi32>
    %9 = arith.cmpi slt, %1, %8 : vector<32x128xi32>
    %10 = arith.andi %7, %9 : vector<32x128xi1>
    %c0_i32_1 = arith.constant 0 : i32
    %11 = vector.broadcast %c0_i32_1 : i32 to vector<32x128xi32>
    %12 = arith.cmpi sge, %2, %11 : vector<32x128xi32>
    %13 = arith.andi %10, %12 : vector<32x128xi1>
    %c33_i32 = arith.constant 33 : i32
    %14 = vector.broadcast %c33_i32 : i32 to vector<32x128xi32>
    %15 = arith.cmpi slt, %2, %14 : vector<32x128xi32>
    %16 = arith.andi %13, %15 : vector<32x128xi1>
    %c16_i32_2 = arith.constant 16 : i32
    %17 = vector.broadcast %c16_i32_2 : i32 to vector<32x128xi32>
    %18 = arith.cmpi sge, %1, %17 : vector<32x128xi32>
    %c32_i32 = arith.constant 32 : i32
    %19 = vector.broadcast %c32_i32 : i32 to vector<32x128xi32>
    %20 = arith.cmpi slt, %1, %19 : vector<32x128xi32>
    %21 = arith.andi %18, %20 : vector<32x128xi1>
    %c33_i32_3 = arith.constant 33 : i32
    %22 = vector.broadcast %c33_i32_3 : i32 to vector<32x128xi32>
    %23 = arith.cmpi sge, %2, %22 : vector<32x128xi32>
    %24 = arith.andi %21, %23 : vector<32x128xi1>
    %c66_i32 = arith.constant 66 : i32
    %25 = vector.broadcast %c66_i32 : i32 to vector<32x128xi32>
    %26 = arith.cmpi slt, %2, %25 : vector<32x128xi32>
    %27 = arith.andi %24, %26 : vector<32x128xi1>
    %cst = arith.constant 0.000000e+00 : f32
    %28 = vector.broadcast %cst : f32 to vector<6x128xf32>
    %c1_i32 = arith.constant 1 : i32
    %29 = vector.broadcast %c1_i32 : i32 to vector<32x128xi32>
    %30 = arith.cmpi eq, %5, %29 : vector<32x128xi32>
    %31 = arith.andi %16, %30 : vector<32x128xi1>
    %c0_i32_4 = arith.constant 0 : i32
    %32 = vector.broadcast %c0_i32_4 : i32 to vector<32x128xi32>
    %33 = arith.cmpi eq, %5, %32 : vector<32x128xi32>
    %34 = arith.andi %27, %33 : vector<32x128xi1>
    %35 = arith.ori %31, %34 : vector<32x128xi1>
    %cst_5 = arith.constant 1.000000e+00 : f32
    %cst_6 = arith.constant 0.000000e+00 : f32
    %36 = vector.broadcast %cst_5 : f32 to vector<32x128xf32>
    %37 = vector.broadcast %cst_6 : f32 to vector<32x128xf32>
    %38 = arith.select %35, %36, %37 : vector<32x128xi1>, vector<32x128xf32>
    %c0_7 = arith.constant 0 : index
    %c0_8 = arith.constant 0 : index
    %c0_9 = arith.constant 0 : index
    %39 = vector.load %arg1[%c0_7, %c0_8, %c0_9] : memref<4x6x4xf32, #tpu.memory_space<vmem>>, vector<1x6x4xf32>
    %40 = vector.shape_cast %39 : vector<1x6x4xf32> to vector<6x4xf32>
    %cst_10 = arith.constant dense<0.000000e+00> : vector<6x32xf32>
    %41 = tpu.matmul %40, %0, %cst_10 {dimension_numbers = #tpu.dot_dimension_numbers<[1], [0], [0], [1], [0, 0, 1, 1], [], []>, precision = #tpu.contract_precision<fp32>} : vector<6x4xf32>, vector<4x32xf32>, vector<6x32xf32> -> vector<6x32xf32>
    %cst_11 = arith.constant dense<0.000000e+00> : vector<6x128xf32>
    %42 = tpu.matmul %41, %38, %cst_11 {dimension_numbers = #tpu.dot_dimension_numbers<[1], [0], [0], [1], [0, 0, 1, 1], [], []>, precision = #tpu.contract_precision<fp32>} : vector<6x32xf32>, vector<32x128xf32>, vector<6x128xf32> -> vector<6x128xf32>
    %43 = arith.addf %28, %42 : vector<6x128xf32>
    %c0_i32_12 = arith.constant 0 : i32
    %44 = vector.broadcast %c0_i32_12 : i32 to vector<32x128xi32>
    %45 = arith.cmpi eq, %5, %44 : vector<32x128xi32>
    %46 = arith.andi %16, %45 : vector<32x128xi1>
    %c-1_i32 = arith.constant -1 : i32
    %47 = vector.broadcast %c-1_i32 : i32 to vector<32x128xi32>
    %48 = arith.cmpi eq, %5, %47 : vector<32x128xi32>
    %49 = arith.andi %27, %48 : vector<32x128xi1>
    %50 = arith.ori %46, %49 : vector<32x128xi1>
    %cst_13 = arith.constant 1.000000e+00 : f32
    %cst_14 = arith.constant 0.000000e+00 : f32
    %51 = vector.broadcast %cst_13 : f32 to vector<32x128xf32>
    %52 = vector.broadcast %cst_14 : f32 to vector<32x128xf32>
    %53 = arith.select %50, %51, %52 : vector<32x128xi1>, vector<32x128xf32>
    %c1 = arith.constant 1 : index
    %c0_15 = arith.constant 0 : index
    %c0_16 = arith.constant 0 : index
    %54 = vector.load %arg1[%c1, %c0_15, %c0_16] : memref<4x6x4xf32, #tpu.memory_space<vmem>>, vector<1x6x4xf32>
    %55 = vector.shape_cast %54 : vector<1x6x4xf32> to vector<6x4xf32>
    %cst_17 = arith.constant dense<0.000000e+00> : vector<6x32xf32>
    %56 = tpu.matmul %55, %0, %cst_17 {dimension_numbers = #tpu.dot_dimension_numbers<[1], [0], [0], [1], [0, 0, 1, 1], [], []>, precision = #tpu.contract_precision<fp32>} : vector<6x4xf32>, vector<4x32xf32>, vector<6x32xf32> -> vector<6x32xf32>
    %cst_18 = arith.constant dense<0.000000e+00> : vector<6x128xf32>
    %57 = tpu.matmul %56, %53, %cst_18 {dimension_numbers = #tpu.dot_dimension_numbers<[1], [0], [0], [1], [0, 0, 1, 1], [], []>, precision = #tpu.contract_precision<fp32>} : vector<6x32xf32>, vector<32x128xf32>, vector<6x128xf32> -> vector<6x128xf32>
    %58 = arith.addf %43, %57 : vector<6x128xf32>
    %c-1_i32_19 = arith.constant -1 : i32
    %59 = vector.broadcast %c-1_i32_19 : i32 to vector<32x128xi32>
    %60 = arith.cmpi eq, %5, %59 : vector<32x128xi32>
    %61 = arith.andi %16, %60 : vector<32x128xi1>
    %c-2_i32 = arith.constant -2 : i32
    %62 = vector.broadcast %c-2_i32 : i32 to vector<32x128xi32>
    %63 = arith.cmpi eq, %5, %62 : vector<32x128xi32>
    %64 = arith.andi %27, %63 : vector<32x128xi1>
    %65 = arith.ori %61, %64 : vector<32x128xi1>
    %cst_20 = arith.constant 1.000000e+00 : f32
    %cst_21 = arith.constant 0.000000e+00 : f32
    %66 = vector.broadcast %cst_20 : f32 to vector<32x128xf32>
    %67 = vector.broadcast %cst_21 : f32 to vector<32x128xf32>
    %68 = arith.select %65, %66, %67 : vector<32x128xi1>, vector<32x128xf32>
    %c2 = arith.constant 2 : index
    %c0_22 = arith.constant 0 : index
    %c0_23 = arith.constant 0 : index
    %69 = vector.load %arg1[%c2, %c0_22, %c0_23] : memref<4x6x4xf32, #tpu.memory_space<vmem>>, vector<1x6x4xf32>
    %70 = vector.shape_cast %69 : vector<1x6x4xf32> to vector<6x4xf32>
    %cst_24 = arith.constant dense<0.000000e+00> : vector<6x32xf32>
    %71 = tpu.matmul %70, %0, %cst_24 {dimension_numbers = #tpu.dot_dimension_numbers<[1], [0], [0], [1], [0, 0, 1, 1], [], []>, precision = #tpu.contract_precision<fp32>} : vector<6x4xf32>, vector<4x32xf32>, vector<6x32xf32> -> vector<6x32xf32>
    %cst_25 = arith.constant dense<0.000000e+00> : vector<6x128xf32>
    %72 = tpu.matmul %71, %68, %cst_25 {dimension_numbers = #tpu.dot_dimension_numbers<[1], [0], [0], [1], [0, 0, 1, 1], [], []>, precision = #tpu.contract_precision<fp32>} : vector<6x32xf32>, vector<32x128xf32>, vector<6x128xf32> -> vector<6x128xf32>
    %73 = arith.addf %58, %72 : vector<6x128xf32>
    %c-2_i32_26 = arith.constant -2 : i32
    %74 = vector.broadcast %c-2_i32_26 : i32 to vector<32x128xi32>
    %75 = arith.cmpi eq, %5, %74 : vector<32x128xi32>
    %76 = arith.andi %16, %75 : vector<32x128xi1>
    %c-3_i32 = arith.constant -3 : i32
    %77 = vector.broadcast %c-3_i32 : i32 to vector<32x128xi32>
    %78 = arith.cmpi eq, %5, %77 : vector<32x128xi32>
    %79 = arith.andi %27, %78 : vector<32x128xi1>
    %80 = arith.ori %76, %79 : vector<32x128xi1>
    %cst_27 = arith.constant 1.000000e+00 : f32
    %cst_28 = arith.constant 0.000000e+00 : f32
    %81 = vector.broadcast %cst_27 : f32 to vector<32x128xf32>
    %82 = vector.broadcast %cst_28 : f32 to vector<32x128xf32>
    %83 = arith.select %80, %81, %82 : vector<32x128xi1>, vector<32x128xf32>
    %c3 = arith.constant 3 : index
    %c0_29 = arith.constant 0 : index
    %c0_30 = arith.constant 0 : index
    %84 = vector.load %arg1[%c3, %c0_29, %c0_30] : memref<4x6x4xf32, #tpu.memory_space<vmem>>, vector<1x6x4xf32>
    %85 = vector.shape_cast %84 : vector<1x6x4xf32> to vector<6x4xf32>
    %cst_31 = arith.constant dense<0.000000e+00> : vector<6x32xf32>
    %86 = tpu.matmul %85, %0, %cst_31 {dimension_numbers = #tpu.dot_dimension_numbers<[1], [0], [0], [1], [0, 0, 1, 1], [], []>, precision = #tpu.contract_precision<fp32>} : vector<6x4xf32>, vector<4x32xf32>, vector<6x32xf32> -> vector<6x32xf32>
    %cst_32 = arith.constant dense<0.000000e+00> : vector<6x128xf32>
    %87 = tpu.matmul %86, %83, %cst_32 {dimension_numbers = #tpu.dot_dimension_numbers<[1], [0], [0], [1], [0, 0, 1, 1], [], []>, precision = #tpu.contract_precision<fp32>} : vector<6x32xf32>, vector<32x128xf32>, vector<6x128xf32> -> vector<6x128xf32>
    %88 = arith.addf %73, %87 : vector<6x128xf32>
    %cst_33 = arith.constant dense<0.000000e+00> : vector<6xf32>
    %89 = vector.multi_reduction <add>, %88, %cst_33 [1] : vector<6x128xf32> to vector<6xf32>
    %90 = vector.shape_cast %89 : vector<6xf32> to vector<6x1xf32>
    %cst_34 = arith.constant 0.0151515156 : f32
    %91 = vector.broadcast %cst_34 : f32 to vector<6x1xf32>
    %92 = arith.mulf %90, %91 : vector<6x1xf32>
    %93 = tpu.iota {dimensions = array<i32: 1>} : vector<6x128xi32>
    %c66_i32_35 = arith.constant 66 : i32
    %94 = vector.broadcast %c66_i32_35 : i32 to vector<6x128xi32>
    %95 = arith.cmpi slt, %93, %94 : vector<6x128xi32>
    %96 = vector.broadcast %92 : vector<6x1xf32> to vector<6x128xf32>
    %97 = arith.subf %88, %96 : vector<6x128xf32>
    %cst_36 = arith.constant 0.000000e+00 : f32
    %98 = vector.broadcast %cst_36 : f32 to vector<6x128xf32>
    %99 = arith.select %95, %97, %98 : vector<6x128xi1>, vector<6x128xf32>
    %100 = arith.mulf %99, %99 : vector<6x128xf32>
    %cst_37 = arith.constant dense<0.000000e+00> : vector<6xf32>
    %101 = vector.multi_reduction <add>, %100, %cst_37 [1] : vector<6x128xf32> to vector<6xf32>
    %102 = vector.shape_cast %101 : vector<6xf32> to vector<6x1xf32>
    %cst_38 = arith.constant 0.0151515156 : f32
    %103 = vector.broadcast %cst_38 : f32 to vector<6x1xf32>
    %104 = arith.mulf %102, %103 : vector<6x1xf32>
    %cst_39 = arith.constant 9.99999974E-6 : f32
    %105 = vector.broadcast %cst_39 : f32 to vector<6x1xf32>
    %106 = arith.addf %104, %105 : vector<6x1xf32>
    %107 = math.rsqrt %106 : vector<6x1xf32>
    %108 = vector.broadcast %107 : vector<6x1xf32> to vector<6x128xf32>
    %109 = arith.mulf %99, %108 : vector<6x128xf32>
    %c0_40 = arith.constant 0 : index
    %c0_41 = arith.constant 0 : index
    %110 = vector.load %arg2[%c0_40, %c0_41] : memref<6x1xf32, #tpu.memory_space<vmem>>, vector<6x1xf32>
    %111 = vector.broadcast %110 : vector<6x1xf32> to vector<6x128xf32>
    %112 = arith.mulf %109, %111 : vector<6x128xf32>
    %c0_42 = arith.constant 0 : index
    %c0_43 = arith.constant 0 : index
    %113 = vector.load %arg3[%c0_42, %c0_43] : memref<6x1xf32, #tpu.memory_space<vmem>>, vector<6x1xf32>
    %114 = vector.broadcast %113 : vector<6x1xf32> to vector<6x128xf32>
    %115 = arith.addf %112, %114 : vector<6x128xf32>
    %cst_44 = arith.constant 0.000000e+00 : f32
    %116 = vector.broadcast %cst_44 : f32 to vector<6x128xf32>
    %117 = arith.maximumf %115, %116 : vector<6x128xf32>
    %c0_45 = arith.constant 0 : index
    %c0_46 = arith.constant 0 : index
    %118 = vector.load %arg4[%c0_45, %c0_46] : memref<6x128xf32, #tpu.memory_space<vmem>>, vector<6x128xf32>
    tpu.vector_store %arg4[%c0_45, %c0_46], %117 {strides = array<i32>} : memref<6x128xf32, #tpu.memory_space<vmem>>, vector<6x128xf32>,
    return
  }
}

</mosaic_0001>

<bundles_post_ra>
// kernel: conv1d_transpose_bn_relu.1
= control target key start
LH: loop header
LB: loop body
LE: loop exit
PB: predicated region body
PF: predicated region fallthrough
CT: control target
= control target key end

     0   :  { %vm106_vm0 = vcmask 1043456   ;;  %vm102_vm1 = vcmask 31744   ;;  %v4704_v0 = vmov 0.0   ;;  %vm4705_vm2 = vmmov 0   ;;  %s5277_s0 = inlined_call_operand.vmem [shape: f32[4,32], index: 0, kind: input, shape index: {}]   ;;  %s5278_s1 = inlined_call_operand.vmem [shape: f32[4,6,4], index: 1, kind: input, shape index: {}]   ;;  %s5279_s2 = inlined_call_operand.vmem [shape: f32[6,1], index: 2, kind: input, shape index: {}]   ;;  %s5280_s3 = inlined_call_operand.vmem [shape: f32[6,1], index: 3, kind: input, shape index: {}]   ;;  %s5281_s4 = inlined_call_operand.vmem [shape: f32[6,128], index: 4, kind: output, shape index: {}]  }
   0x1   :  { %4112 = vmatprep.subr.mxu1 %v4704_v0  ;;  %4082 = vmatprep.subr.mxu0 %v4704_v0  ;;  %v17_v1 = vld [vmem:[%s5277_s0] sm:$0xf]  ;;  %v3863_v3 = vld [vmem:[%s5278_s1 + $0x8] sm:$0x3f]  ;;  %v18_v22 = vlaneseq  ;;  %v4706_v34 = vmov 0.0|0.0  }
   0x2   :  { %v101_v2 = vld [vmem:[%s5278_s1] sm:$0x3f]  ;;  %v108_v4 = vsel %vm106_vm0, %v17_v1, 0  ;;  %4084 = vmatprep.mubr.msk.f32.mxu0 %vm4705_vm2, %v4704_v0  ;;  %4114 = vmatprep.mubr.msk.f32.mxu1 %vm4705_vm2, %v4704_v0  ;;  %v579_v6 = vsel %vm102_vm1, %v3863_v3, 0  ;;  %v4707_v40 = vmov 1.0|1.0  }
   0x3   :  { %v104_v5 = vsel %vm102_vm1, %v101_v2, 0  ;;  %v4751_v7 = vand.u32 4294901760, %v108_v4  ;;  %v647_v9 = vand.u32 4294901760, %v579_v6  ;;  %v19_v23 = vshrl.u32 %v18_v22, 7 }
   0x4   :  { %v176_v8 = vand.u32 4294901760, %v104_v5  ;;  %v4809_v25 = vand.u32 127, %v18_v22 }
   0x5   :  { %4113 = vmatpush3.msra.mxu1 %v4751_v7  ;;  %4083 = vmatpush3.msra.mxu0 %v4751_v7  ;;  %v648_v11 = vsub.f32 %v579_v6, %v647_v9  ;;  %v4756_v12 = vsub.f32 %v108_v4, %v4751_v7  ;;  %v20_v24 = vadd.s32 8, %v19_v23  ;;  %v25_v26 = vmul.u32 2, %v19_v23 }
   0x6   :  { %v177_v10 = vsub.f32 %v104_v5, %v176_v8  ;;  %4117 = vmatprep.subr.mxu1 %v4704_v0  ;;  %4087 = vmatprep.subr.mxu0 %v4704_v0  ;;  %v21_v30 = vadd.s32 16, %v19_v23  ;;  %v22_v31 = vadd.s32 24, %v19_v23  ;;  %vm50_vm3 = vcmp.lt.s32.totalorder %v4809_v25, 33 }
   0x7   :  { %v649_v14 = vand.u32 4294901760, %v648_v11  ;;  %v4761_v15 = vand.u32 4294901760, %v4756_v12  ;;  %v26_v27 = vmul.u32 2, %v20_v24  ;;  %v4812_v28 = vsub.s32 %v25_v26, %v4809_v25 }
   0x8   :  { %v178_v13 = vand.u32 4294901760, %v177_v10  ;;  %v27_v32 = vmul.u32 2, %v21_v30  ;;  %v28_v33 = vmul.u32 2, %v22_v31  ;;  %vm67_vm12 = vcmp.ge.s32.totalorder %v4809_v25, 33 }
   0x9   :  { %v650_v17 = vsub.f32 %v648_v11, %v649_v14  ;;  %v190_v18 = vsub.f32 %v4756_v12, %v4761_v15  ;;  %v4815_v29 = vsub.s32 %v26_v27, %v4809_v25  ;;  %vm77_vm4 = vcmp.eq.s32.totalorder %v4812_v28, 1 }
   0xa   :  { %v179_v16 = vsub.f32 %v177_v10, %v178_v13  ;;  %vm81_vm6 = vmand %vm50_vm3, %vm77_vm4  ;;  %vm85_vm8 = vcmp.eq.s32.totalorder %v4812_v28, 0  ;;  %v4833_v36 = vsub.s32 %v27_v32, %v4809_v25  ;;  %v4836_v37 = vsub.s32 %v28_v33, %v4809_v25 }
   0xb   :  { %v651_v20 = vand.u32 4294901760, %v650_v17  ;;  %v4765_v21 = vand.u32 4294901760, %v190_v18  ;;  %vm78_vm5 = vcmp.eq.s32.totalorder %v4815_v29, 1  ;;  %vm86_vm9 = vcmp.eq.s32.totalorder %v4815_v29, 0  ;;  %vm556_vm11 = vmand %vm50_vm3, %vm85_vm8 }
   0xc   :  { %v180_v19 = vand.u32 4294901760, %v179_v16  ;;  %vm82_vm7 = vmand %vm50_vm3, %vm78_vm5  ;;  %v97_v38 = vsel %vm81_vm6, 1.0, %v4704_v0  ;;  %vm72_vm13 = vcmp.lt.s32.totalorder %v4809_v25, 66  ;;  %v572_v43 = vsel %vm556_vm11, 1.0, %v4704_v0 }
   0xd   :  { %4115 = vmatmul.mubr.f32.vlgmr.msra.gmra.mrb[0].mxu1 %v651_v20  ;;  %vm4828_vm10 = vmpackc.low %vm82_vm7, %vm81_vm6  ;;  %v98_v39 = vsel %vm82_vm7, 1.0, %v4704_v0  ;;  %v4847_v41 = vsub.f32 %v97_v38, %v97_v38  ;;  %vm87_vm15 = vcmp.eq.s32.totalorder %v4833_v36, 0  ;;  %v4861_v46 = vsub.f32 %v572_v43, %v572_v43 }
   0xe   :  { %4085 = vmatmul.mubr.f32.vlgmr.msra.gmra.mrb[0].mxu0 %v180_v19  ;;  %4118 = vmatpush3.msra.mxu1 %v4765_v21  ;;  %v4849_v42 = vsub.f32 %v98_v39, %v98_v39  ;;  %vm557_vm14 = vmand %vm50_vm3, %vm86_vm9  ;;  %vm88_vm4 = vcmp.eq.s32.totalorder %v4836_v37, 0  ;;  %vm562_vm7 = vcmp.eq.s32.totalorder %v4833_v36, 4294967295  ;;  %vm563_vm9 = vcmp.eq.s32.totalorder %v4836_v37, 4294967295 }
   0xf   :  { %4088 = vmatpush3.msra.mxu0 %v4765_v21  ;;  %4089 = vmatprep.mubr.msk.f32.mxu0 %vm4705_vm2, %v4704_v0  ;;  %v573_v44 = vsel %vm557_vm14, 1.0, %v4704_v0  ;;  %vm4857_vm0 = vmpackc.low %vm557_vm14, %vm556_vm11  ;;  %v1572_v49 = vand.u32 4294901760, %v4847_v41  ;;  %v1108_v51 = vand.u32 4294901760, %v4861_v46 }
  0x10   :  { %4119 = vmatprep.mubr.msk.f32.mxu1 %vm4705_vm2, %v4704_v0  ;;  %4122 = vmatprep.subr.mxu1 %v4704_v0  ;;  %v4867_v47 = vsub.f32 %v573_v44, %v573_v44  ;;  %vm4871_vm5 = vmand %vm67_vm12, %vm72_vm13  ;;  %v1578_v50 = vand.u32 4294901760, %v4849_v42  ;;  %v4515_v44 = vpack.c.bf16 %v4849_v42, %v4847_v41 }
  0x11   :  { %4092 = vmatprep.subr.mxu0 %v4704_v0  ;;  %vm91_vm6 = vmand %vm4871_vm5, %vm87_vm15  ;;  %v1109_v58 = vsub.f32 %v4861_v46, %v1108_v51  ;;  %v1573_v24 = vsub.f32 %v4847_v41, %v1572_v49  ;;  %v3901_v41 = vld [vmem:[%s5278_s1 + $0x18] sm:$0x3f] }
  0x12   :  { %vm92_vm8 = vmand %vm4871_vm5, %vm88_vm4  ;;  %v99_v52 = vsel %vm91_vm6, 1.0, %v4704_v0  ;;  %v4527_v53 = vpack.c.bf16 %v1578_v50, %v1572_v49  ;;  %v1114_v54 = vand.u32 4294901760, %v4867_v47  ;;  %v4479_v18 = vpack.c.bf16 %v4867_v47, %v4861_v46 }
  0x13   :  { %v100_v55 = vsel %vm92_vm8, 1.0, %v4704_v0  ;;  %vm4888_vm11 = vmpackc.low %vm92_vm8, %vm91_vm6  ;;  %v4892_v57 = vsub.f32 %v99_v52, %v99_v52  ;;  %v1110_v62 = vand.u32 4294901760, %v1109_v58  ;;  %v1579_v26 = vsub.f32 %v4849_v42, %v1578_v50 }
  0x14   :  { %v4895_v59 = vsub.f32 %v100_v55, %v100_v55  ;;  %vm566_vm12 = vmand %vm4871_vm5, %vm562_vm7  ;;  %v1115_v60 = vsub.f32 %v4867_v47, %v1114_v54  ;;  %v4491_v22 = vpack.c.bf16 %v1114_v54, %v1108_v51  ;;  %v1574_v27 = vand.u32 4294901760, %v1573_v24 }
  0x15   :  { %4120 = vmatmul.mubr.f32.vlgmr.msra.gmra.mrb[0].mxu1 %v647_v9  ;;  %vm567_vm14 = vmand %vm4871_vm5, %vm563_vm9  ;;  %v574_v61 = vsel %vm566_vm12, 1.0, %v4704_v0  ;;  %v1584_v63 = vand.u32 4294901760, %v4892_v57  ;;  %v1580_v30 = vand.u32 4294901760, %v1579_v26  ;;  %vm1027_vm4 = vcmask 261120  }
  0x16   :  { %4090 = vmatmul.mubr.f32.vlgmr.msra.gmra.mrb[0].mxu0 %v176_v8  ;;  %4123 = vmatpush3.msra.mxu1 %v4756_v12  ;;  %v575_v1 = vsel %vm567_vm14, 1.0, %v4704_v0  ;;  %vm4909_vm15 = vmpackc.low %vm567_vm14, %vm566_vm12  ;;  %v4913_v3 = vsub.f32 %v574_v61, %v574_v61  ;;  %v1116_v4 = vand.u32 4294901760, %v1115_v60  ;;  %v1590_v5 = vand.u32 4294901760, %v4895_v59 }
  0x17   :  { %4093 = vmatpush3.msra.mxu0 %v4756_v12  ;;  %4094 = vmatprep.mubr.msk.f32.mxu0 %vm4705_vm2, %v4704_v0  ;;  %v4919_v6 = vsub.f32 %v575_v1, %v575_v1  ;;  %v4934_v31 = vpack.c.bf16 %v1580_v30, %v1574_v27  ;;  %v1585_v32 = vsub.f32 %v4892_v57, %v1584_v63  ;;  %v2915_v42 = vsel %vm102_vm1, %v3901_v41, 0 }
  0x18   :  { %4124 = vmatprep.mubr.msk.f32.mxu1 %vm4705_vm2, %v4704_v0  ;;  %4127 = vmatprep.subr.mxu1 %v4704_v0  ;;  %v1591_v33 = vsub.f32 %v4895_v59, %v1590_v5  ;;  %v4518_v46 = vpack.c.bf16 %v4895_v59, %v4892_v57  ;;  %v2983_v57 = vand.u32 4294901760, %v2915_v42  ;;  %vm1962_vm8 = vcmp.eq.s32.totalorder %v4833_v36, 4294967294 }
  0x19   :  { %4097 = vmatprep.subr.mxu0 %v4704_v0  ;;  %v4482_v20 = vpack.c.bf16 %v4919_v6, %v4913_v3  ;;  %v1586_v38 = vand.u32 4294901760, %v1585_v32  ;;  %vm1963_vm9 = vcmp.eq.s32.totalorder %v4836_v37, 4294967294 }
  0x1a   :  { %v1592_v39 = vand.u32 4294901760, %v1591_v33  ;;  %v2984_v59 = vsub.f32 %v2915_v42, %v2983_v57  ;;  %vm1967_vm12 = vmand %vm4871_vm5, %vm1963_vm9 }
  0x1c   :  { %v4938_v43 = vpack.c.bf16 %v1592_v39, %v1586_v38 }
  0x1d   :  { %4125 = vmatmul.mubr.f32.vlgmr.msra.gmra.mrb[0].mxu1 %v648_v11  ;;  %v1126_v11 = vand.u32 4294901760, %v4919_v6 }
  0x1e   :  { %4095 = vmatmul.mubr.f32.vlgmr.msra.gmra.mrb[0].mxu0 %v177_v10  ;;  %4128 = vmatpush3.msra.mxu1 %v4751_v7  ;;  %v1120_v10 = vand.u32 4294901760, %v4913_v3 }
  0x1f   :  { %4098 = vmatpush3.msra.mxu0 %v4751_v7  ;;  %4099 = vmatprep.mubr.msk.f32.mxu0 %vm4705_vm2, %v4704_v0 }
  0x20   :  { %4129 = vmatprep.mubr.msk.f32.mxu1 %vm4705_vm2, %v4704_v0  ;;  %4132 = vmatprep.subr.mxu1 %v4704_v0  ;;  %v4930_v23 = vpack.c.bf16 %v1126_v11, %v1120_v10 }
  0x21   :  { %4102 = vmatprep.subr.mxu0 %v4704_v0 }
  0x25   :  { %4130 = vmatmul.mubr.f32.vlgmr.msra.gmra.mrb[0].mxu1 %v649_v14  ;;  %v1127_v14 = vsub.f32 %v4919_v6, %v1126_v11 }
  0x26   :  { %4100 = vmatmul.mubr.f32.vlgmr.msra.gmra.mrb[0].mxu0 %v178_v13  ;;  %4133 = vmatpush3.msra.mxu1 %v4761_v15  ;;  %v1121_v13 = vsub.f32 %v4913_v3, %v1120_v10 }
  0x27   :  { %4103 = vmatpush3.msra.mxu0 %v4761_v15  ;;  %4104 = vmatprep.mubr.msk.f32.mxu0 %vm4705_vm2, %v4704_v0  ;;  %v1128_v17 = vand.u32 4294901760, %v1127_v14 }
  0x28   :  { %4134 = vmatprep.mubr.msk.f32.mxu1 %vm4705_vm2, %v4704_v0  ;;  %4137 = vmatprep.subr.mxu1 %v4704_v0  ;;  %v1122_v16 = vand.u32 4294901760, %v1121_v13 }
  0x29   :  { %4107 = vmatprep.subr.mxu0 %v4704_v0 }
  0x2a   :  { %v4476_v19 = vpack.c.bf16 %v1128_v17, %v1122_v16 }
  0x2d   :  { %4135 = vmatmul.mubr.f32.vlgmr.msra.gmra.mrb[0].mxu1 %v647_v9 }
  0x2e   :  { %4105 = vmatmul.mubr.f32.vlgmr.msra.gmra.mrb[0].mxu0 %v176_v8  ;;  %4138 = vmatpush3.msra.mxu1 %v4751_v7 }
  0x2f   :  { %4108 = vmatpush3.msra.mxu0 %v4751_v7  ;;  %4109 = vmatprep.mubr.msk.f32.mxu0 %vm4705_vm2, %v4704_v0 }
  0x30   :  { %4139 = vmatprep.mubr.msk.f32.mxu1 %vm4705_vm2, %v4704_v0  ;;  %4520 = vmatprep.subr.bf16.mxu0 %v4706_v34 }
  0x31   :  { %4466 = vmatprep.subr.bf16.mxu1 %v4706_v34 }
  0x35   :  { %4140 = vmatmul.mubr.f32.vlgmr.msra.gmra.mrb[0].mxu1 %v647_v9  ;;  %v4530_v9 = vpack.c.bf16 %v1590_v5, %v1584_v63 }
  0x36   :  { %4110 = vmatmul.mubr.f32.vlgmr.msra.gmra.mrb[0].mxu0 %v176_v8  ;;  %4150 = vmatprep.mubr.msk.f32.mxu1 %vm4705_vm2, %v4704_v0  ;;  %v4473_v8 = vpack.c.bf16 %v1116_v4, %v1110_v62 }
  0x37   :  { %4249 = vmatprep.mubr.msk.f32.mxu0 %vm4705_vm2, %v4704_v0  ;;  %4522 = vmatpush3.bf16.msk.msra.mxu0 %vm4828_vm10, %v4707_v40 }
  0x38   :  { %4523 = vmatprep.subr.bf16.mxu0 %v4706_v34  ;;  %4468 = vmatpush3.bf16.msk.msra.mxu1 %vm4857_vm0, %v4707_v40 }
  0x39   :  { %4469 = vmatprep.subr.bf16.mxu1 %v4706_v34 }
  0x3b   :  { %4525 = vmatpush3.bf16.msk.msra.mxu0 %vm4888_vm11, %v4707_v40 }
  0x3c   :  { %4526 = vmatprep.subr.bf16.mxu0 %v4706_v34  ;;  %4471 = vmatpush3.bf16.msk.msra.mxu1 %vm4909_vm15, %v4707_v40 }
  0x3d   :  { %4472 = vmatprep.subr.bf16.mxu1 %v4706_v34 }
 0x108   :  { %v1023_v49 = vpop.f32.mrb[0].mxu1 }
 0x109   :  { %v552_v47 = vpop.f32.mrb[0].mxu0  ;;  %v1029_v51 = vsel %vm1027_vm4, %v1023_v49, 0  ;;  %v4141_v52 = vpop.f32.mrb[1].mxu1 }
 0x10a   :  { %v1493_v50 = vsel %vm1027_vm4, %v552_v47, 0  ;;  %v4111_v54 = vpop.f32.mrb[1].mxu0  ;;  %v1096_v58 = vand.u32 4294901760, %v1029_v51 }
 0x10b   :  { %v4946_v55 = vand.u32 4294901760, %v1493_v50 }
 0x10c   :  { %v1097_v61 = vsub.f32 %v1029_v51, %v1096_v58 }
 0x10d   :  { %v4949_v60 = vsub.f32 %v1493_v50, %v4946_v55 }
 0x10e   :  { %v1098_v63 = vand.u32 4294901760, %v1097_v61 }
 0x10f   :  { %v1562_v62 = vand.u32 4294901760, %v4949_v60 }
 0x110   :  { %v1099_v1 = vsub.f32 %v1097_v61, %v1098_v63 }
 0x111   :  { %4250 = vmatmul.mubr.f32.vlgmr.msra.gmra.mrb[2].mxu0 %v1562_v62  ;;  %v1563_v45 = vsub.f32 %v4949_v60, %v1562_v62 }
 0x112   :  { %4528 = vmatpush3.bf16.msra.mxu0 %v4527_v53  ;;  %4260 = vmatprep.mubr.msk.f32.mxu0 %vm4705_vm2, %v4704_v0  ;;  %v1100_v3 = vand.u32 4294901760, %v1099_v1  ;;  %v3888_v53 = vld [vmem:[%s5278_s1 + $0x10] sm:$0x3f] }
 0x113   :  { %4529 = vmatprep.subr.bf16.mxu0 %v4706_v34  ;;  %v1979_v2 = vsel %vm102_vm1, %v3888_v53, 0  ;;  %v1564_v4 = vand.u32 4294901760, %v1563_v45  ;;  %vm560_vm1 = vcmp.eq.s32.totalorder %v4812_v28, 4294967295 }
 0x114   :  { %4151 = vmatmul.mubr.f32.vlgmr.msra.gmra.mrb[2].mxu1 %v1100_v3  ;;  %v2047_v35 = vand.u32 4294901760, %v1979_v2 }
 0x115   :  { %4474 = vmatpush3.bf16.msra.mxu1 %v4473_v8  ;;  %4161 = vmatprep.mubr.msk.f32.mxu1 %vm4705_vm2, %v4704_v0 }
 0x116   :  { %4531 = vmatpush3.bf16.msra.mxu0 %v4530_v9  ;;  %4475 = vmatprep.subr.bf16.mxu1 %v4706_v34  ;;  %v2048_v5 = vsub.f32 %v1979_v2, %v2047_v35  ;;  %v2985_v9 = vand.u32 4294901760, %v2984_v59 }
 0x117   :  { %4532 = vmatprep.subr.bf16.mxu0 %v4706_v34 }
 0x118   :  { %v2049_v56 = vand.u32 4294901760, %v2048_v5  ;;  %v2986_v10 = vsub.f32 %v2984_v59, %v2985_v9 }
 0x119   :  { %4261 = vmatmul.mubr.f32.vlgmr.msra.gmra.mrb[2].mxu0 %v4946_v55  ;;  %4477 = vmatpush3.bf16.msra.mxu1 %v4476_v19 }
 0x11a   :  { %4534 = vmatpush3.bf16.msk.msra.mxu0 %vm4828_vm10, %v4707_v40  ;;  %4478 = vmatprep.subr.bf16.mxu1 %v4706_v34  ;;  %v2050_v6 = vsub.f32 %v2048_v5, %v2049_v56  ;;  %v2987_v11 = vand.u32 4294901760, %v2986_v10 }
 0x11b   :  { %4535 = vmatprep.subr.bf16.mxu0 %v4706_v34  ;;  %4271 = vmatprep.mubr.msk.f32.mxu0 %vm4705_vm2, %v4704_v0 }
 0x11c   :  { %4162 = vmatmul.mubr.f32.vlgmr.msra.gmra.mrb[2].mxu1 %v1096_v58  ;;  %v2051_v8 = vand.u32 4294901760, %v2050_v6 }
 0x11d   :  { %4480 = vmatpush3.bf16.msra.mxu1 %v4479_v18  ;;  %4172 = vmatprep.mubr.msk.f32.mxu1 %vm4705_vm2, %v4704_v0  ;;  %v1975_v18 = vsel %vm1967_vm12, 1.0, %v4704_v0 }
 0x11e   :  { %4537 = vmatpush3.bf16.msk.msra.mxu0 %vm4888_vm11, %v4707_v40  ;;  %4481 = vmatprep.subr.bf16.mxu1 %v4706_v34 }
 0x11f   :  { %4538 = vmatprep.subr.bf16.mxu0 %v4706_v34 }
 0x121   :  { %4272 = vmatmul.mubr.f32.vlgmr.msra.gmra.mrb[2].mxu0 %v4946_v55  ;;  %4483 = vmatpush3.bf16.msra.mxu1 %v4482_v20 }
 0x122   :  { %4312 = vmatprep.mubr.msk.f32.mxu0 %vm4705_vm2, %v4704_v0  ;;  %4484 = vmatprep.subr.bf16.mxu1 %v4706_v34 }
 0x124   :  { %4173 = vmatmul.mubr.f32.vlgmr.msra.gmra.mrb[2].mxu1 %v1097_v61 }
 0x125   :  { %4486 = vmatpush3.bf16.msk.msra.mxu1 %vm4857_vm0, %v4707_v40  ;;  %4183 = vmatprep.mubr.msk.f32.mxu1 %vm4705_vm2, %v4704_v0 }
 0x126   :  { %4487 = vmatprep.subr.bf16.mxu1 %v4706_v34 }
 0x129   :  { %4489 = vmatpush3.bf16.msk.msra.mxu1 %vm4909_vm15, %v4707_v40 }
 0x12a   :  { %4490 = vmatprep.subr.bf16.mxu1 %v4706_v34 }
 0x12c   :  { %4184 = vmatmul.mubr.f32.vlgmr.msra.gmra.mrb[2].mxu1 %v1098_v63 }
 0x12d   :  { %4492 = vmatpush3.bf16.msra.mxu1 %v4491_v22  ;;  %4194 = vmatprep.mubr.msk.f32.mxu1 %vm4705_vm2, %v4704_v0 }
 0x12e   :  { %4493 = vmatprep.subr.bf16.mxu1 %v4706_v34 }
 0x131   :  { %4495 = vmatpush3.bf16.msra.mxu1 %v4930_v23  ;;  %v2524_v23 = vsub.f32 %v1975_v18, %v1975_v18 }
 0x132   :  { %4496 = vmatprep.subr.bf16.mxu1 %v4706_v34 }
 0x134   :  { %4195 = vmatmul.mubr.f32.vlgmr.msra.gmra.mrb[2].mxu1 %v1096_v58 }
 0x135   :  { %4498 = vmatpush3.bf16.msk.msra.mxu1 %vm4857_vm0, %v4707_v40  ;;  %4205 = vmatprep.mubr.msk.f32.mxu1 %vm4705_vm2, %v4704_v0  ;;  %vm1956_vm0 = vmand %vm50_vm3, %vm560_vm1  ;;  %vm1961_vm1 = vcmp.eq.s32.totalorder %v4815_v29, 4294967294 }
 0x136   :  { %4499 = vmatprep.subr.bf16.mxu1 %v4706_v34 }
 0x139   :  { %4501 = vmatpush3.bf16.msk.msra.mxu1 %vm4909_vm15, %v4707_v40  ;;  %vm1960_vm15 = vcmp.eq.s32.totalorder %v4812_v28, 4294967294 }
 0x13a   :  { %4502 = vmatprep.subr.bf16.mxu1 %v4706_v34 }
 0x13c   :  { %4206 = vmatmul.mubr.f32.vlgmr.msra.gmra.mrb[2].mxu1 %v1096_v58 }
 0x13d   :  { %4504 = vmatpush3.bf16.msk.msra.mxu1 %vm4828_vm10, %v4707_v40  ;;  %4216 = vmatprep.mubr.msk.f32.mxu1 %vm4705_vm2, %v4704_v0  ;;  %vm561_vm10 = vcmp.eq.s32.totalorder %v4815_v29, 4294967295 }
 0x13e   :  { %4505 = vmatprep.subr.bf16.mxu1 %v4706_v34  ;;  %vm1957_vm6 = vmand %vm50_vm3, %vm561_vm10 }
 0x13f   :  { %vm5095_vm7 = vmpackc.low %vm1957_vm6, %vm1956_vm0 }
 0x140   :  { %4540 = vmatpush3.bf16.msk.msra.mxu0 %vm5095_vm7, %v4707_v40  ;;  %vm5148_vm10 = vmand %vm50_vm3, %vm1960_vm15 }
 0x141   :  { %4507 = vmatpush3.bf16.msk.msra.mxu1 %vm4888_vm11, %v4707_v40  ;;  %vm1966_vm11 = vmand %vm4871_vm5, %vm1962_vm8  ;;  %4541 = vmatprep.subr.bf16.mxu0 %v4706_v34  ;;  %vm2899_vm8 = vcmp.eq.s32.totalorder %v4836_v37, 4294967293  ;;  %v2908_v28 = vsel %vm5148_vm10, 1.0, %v4704_v0 }
 0x142   :  { %4508 = vmatprep.subr.bf16.mxu1 %v4706_v34  ;;  %v1974_v16 = vsel %vm1966_vm11, 1.0, %v4704_v0  ;;  %vm5111_vm14 = vmpackc.low %vm1967_vm12, %vm1966_vm11  ;;  %v5181_v53 = vsub.f32 %v2908_v28, %v2908_v28 }
 0x143   :  { %v2518_v19 = vsub.f32 %v1974_v16, %v1974_v16  ;;  %vm5177_vm9 = vmand %vm4871_vm5, %vm2899_vm8 }
 0x144   :  { %4217 = vmatmul.mubr.f32.vlgmr.msra.gmra.mrb[2].mxu1 %v1564_v4  ;;  %4543 = vmatpush3.bf16.msk.msra.mxu0 %vm5111_vm14, %v4707_v40 }
 0x145   :  { %4510 = vmatpush3.bf16.msra.mxu1 %v4934_v31  ;;  %4227 = vmatprep.mubr.msk.f32.mxu1 %vm4705_vm2, %v4704_v0  ;;  %v2519_v27 = vand.u32 4294901760, %v2518_v19  ;;  %v2525_v31 = vand.u32 4294901760, %v2524_v23  ;;  %v4554_v47 = vpack.c.bf16 %v2524_v23, %v2518_v19 }
 0x146   :  { %4511 = vmatprep.subr.bf16.mxu1 %v4706_v34  ;;  %4544 = vmatprep.subr.bf16.mxu0 %v4706_v34 }
 0x147   :  { %v2520_v32 = vsub.f32 %v2518_v19, %v2519_v27  ;;  %v2526_v38 = vsub.f32 %v2524_v23, %v2525_v31  ;;  %v4566_v50 = vpack.c.bf16 %v2525_v31, %v2519_v27 }
 0x149   :  { %4513 = vmatpush3.bf16.msra.mxu1 %v4938_v43  ;;  %v2521_v39 = vand.u32 4294901760, %v2520_v32  ;;  %v2527_v43 = vand.u32 4294901760, %v2526_v38 }
 0x14a   :  { %4514 = vmatprep.subr.bf16.mxu1 %v4706_v34 }
 0x14c   :  { %4228 = vmatmul.mubr.f32.vlgmr.msra.gmra.mrb[2].mxu1 %v4946_v55 }
 0x14d   :  { %4516 = vmatpush3.bf16.msra.mxu1 %v4515_v44  ;;  %4238 = vmatprep.mubr.msk.f32.mxu1 %vm4705_vm2, %v4704_v0  ;;  %v4548_v44 = vpack.c.bf16 %v2527_v43, %v2521_v39  ;;  %v4708_v43 = vmov 0  }
 0x14e   :  { %4517 = vmatprep.subr.bf16.mxu1 %v4706_v34  ;;  %4700 = vset.pattern.permute.xlu1 %v4708_v43 }
 0x14f   :  { %4701 = vset.pattern.permute.xlu0 %v4708_v43 }
 0x151   :  { %4519 = vmatpush3.bf16.msra.mxu1 %v4518_v46 }
 0x152   :  { %4274 = vmatprep.subr.mxu1 %v4704_v0 }
 0x154   :  { %4239 = vmatmul.mubr.f32.vlgmr.msra.gmra.mrb[2].mxu1 %v4949_v60 }
 0x155   :  { %4275 = vmatpush3.msra.mxu1 %v4751_v7  ;;  %4276 = vmatprep.mubr.msk.f32.mxu1 %vm4705_vm2, %v4704_v0 }
 0x156   :  { %4279 = vmatprep.subr.mxu1 %v4704_v0 }
 0x158   :  { %4277 = vmatmul.mubr.f32.vlgmr.msra.gmra.mrb[4].mxu1 %v2051_v8 }
 0x159   :  { %4280 = vmatpush3.msra.mxu1 %v4765_v21  ;;  %4281 = vmatprep.mubr.msk.f32.mxu1 %vm4705_vm2, %v4704_v0 }
 0x15a   :  { %4284 = vmatprep.subr.mxu1 %v4704_v0 }
 0x160   :  { %4282 = vmatmul.mubr.f32.vlgmr.msra.gmra.mrb[4].mxu1 %v2047_v35 }
 0x161   :  { %4285 = vmatpush3.msra.mxu1 %v4756_v12  ;;  %4286 = vmatprep.mubr.msk.f32.mxu1 %vm4705_vm2, %v4704_v0 }
 0x162   :  { %4289 = vmatprep.subr.mxu1 %v4704_v0 }
 0x168   :  { %4287 = vmatmul.mubr.f32.vlgmr.msra.gmra.mrb[4].mxu1 %v2048_v5  ;;  %v3443_v5 = vand.u32 4294901760, %v5181_v53 }
 0x169   :  { %4290 = vmatpush3.msra.mxu1 %v4751_v7  ;;  %4291 = vmatprep.mubr.msk.f32.mxu1 %vm4705_vm2, %v4704_v0 }
 0x16a   :  { %4294 = vmatprep.subr.mxu1 %v4704_v0 }
 0x170   :  { %4292 = vmatmul.mubr.f32.vlgmr.msra.gmra.mrb[4].mxu1 %v2049_v56 }
 0x171   :  { %4295 = vmatpush3.msra.mxu1 %v4761_v15  ;;  %4296 = vmatprep.mubr.msk.f32.mxu1 %vm4705_vm2, %v4704_v0 }
 0x172   :  { %4299 = vmatprep.subr.mxu1 %v4704_v0 }
 0x178   :  { %4297 = vmatmul.mubr.f32.vlgmr.msra.gmra.mrb[4].mxu1 %v2047_v35 }
 0x179   :  { %4300 = vmatpush3.msra.mxu1 %v4751_v7  ;;  %4301 = vmatprep.mubr.msk.f32.mxu1 %vm4705_vm2, %v4704_v0 }
 0x17a   :  { %4370 = vmatprep.subr.mxu1 %v4704_v0 }
 0x180   :  { %4302 = vmatmul.mubr.f32.vlgmr.msra.gmra.mrb[4].mxu1 %v2047_v35  ;;  %v2911_v35 = vsel %vm5177_vm9, 1.0, %v4704_v0 }
 0x181   :  { %4371 = vmatpush3.msra.mxu1 %v4751_v7  ;;  %4372 = vmatprep.mubr.msk.f32.mxu1 %vm4705_vm2, %v4704_v0  ;;  %v3460_v41 = vsub.f32 %v2911_v35, %v2911_v35 }
 0x182   :  { %4375 = vmatprep.subr.mxu1 %v4704_v0 }
 0x184   :  { %4373 = vmatmul.mubr.f32.vlgmr.msra.gmra.mrb[6].mxu1 %v2987_v11 }
 0x185   :  { %4376 = vmatpush3.msra.mxu1 %v4765_v21  ;;  %4377 = vmatprep.mubr.msk.f32.mxu1 %vm4705_vm2, %v4704_v0 }
 0x186   :  { %4380 = vmatprep.subr.mxu1 %v4704_v0 }
 0x18c   :  { %4378 = vmatmul.mubr.f32.vlgmr.msra.gmra.mrb[6].mxu1 %v2983_v57 }
 0x18d   :  { %4381 = vmatpush3.msra.mxu1 %v4756_v12  ;;  %4382 = vmatprep.mubr.msk.f32.mxu1 %vm4705_vm2, %v4704_v0  ;;  %v1972_v12 = vsel %vm1956_vm0, 1.0, %v4704_v0  ;;  %vm5154_vm0 = vmand %vm50_vm3, %vm1961_vm1 }
 0x18e   :  { %4385 = vmatprep.subr.mxu1 %v4704_v0  ;;  %v2506_v21 = vsub.f32 %v1972_v12, %v1972_v12  ;;  %v2909_v29 = vsel %vm5154_vm0, 1.0, %v4704_v0  ;;  %v3461_v12 = vand.u32 4294901760, %v3460_v41 }
 0x18f   :  { %v3448_v2 = vsub.f32 %v2909_v29, %v2909_v29 }
 0x190   :  { %v2507_v14 = vand.u32 4294901760, %v2506_v21  ;;  %v3462_v16 = vsub.f32 %v3460_v41, %v3461_v12 }
 0x191   :  { %v3449_v42 = vand.u32 4294901760, %v3448_v2 }
 0x192   :  { %v2508_v20 = vsub.f32 %v2506_v21, %v2507_v14  ;;  %v3463_v22 = vand.u32 4294901760, %v3462_v16 }
 0x193   :  { %v3450_v10 = vsub.f32 %v3448_v2, %v3449_v42 }
 0x194   :  { %4383 = vmatmul.mubr.f32.vlgmr.msra.gmra.mrb[6].mxu1 %v2984_v59  ;;  %v2509_v26 = vand.u32 4294901760, %v2508_v20 }
 0x195   :  { %4386 = vmatpush3.msra.mxu1 %v4751_v7  ;;  %4387 = vmatprep.mubr.msk.f32.mxu1 %vm4705_vm2, %v4704_v0 }
 0x196   :  { %4390 = vmatprep.subr.mxu1 %v4704_v0 }
 0x19c   :  { %4388 = vmatmul.mubr.f32.vlgmr.msra.gmra.mrb[6].mxu1 %v2985_v9  ;;  %v3444_v9 = vsub.f32 %v5181_v53, %v3443_v5 }
 0x19d   :  { %4391 = vmatpush3.msra.mxu1 %v4761_v15  ;;  %4392 = vmatprep.mubr.msk.f32.mxu1 %vm4705_vm2, %v4704_v0  ;;  %v1973_v15 = vsel %vm1957_vm6, 1.0, %v4704_v0  ;;  %vm2898_vm6 = vcmp.eq.s32.totalorder %v4833_v36, 4294967293 }
 0x19e   :  { %4395 = vmatprep.subr.mxu1 %v4704_v0  ;;  %v2512_v13 = vsub.f32 %v1973_v15, %v1973_v15  ;;  %vm5171_vm3 = vmand %vm4871_vm5, %vm2898_vm6 }
 0x19f   :  { %v2910_v4 = vsel %vm5171_vm3, 1.0, %v4704_v0  ;;  %vm5208_vm5 = vmpackc.low %vm5154_vm0, %vm5148_vm10 }
 0x1a0   :  { %v2513_v17 = vand.u32 4294901760, %v2512_v13  ;;  %v4551_v46 = vpack.c.bf16 %v2512_v13, %v2506_v21  ;;  %v3454_v8 = vsub.f32 %v2910_v4, %v2910_v4 }
 0x1a2   :  { %v2514_v24 = vsub.f32 %v2512_v13, %v2513_v17  ;;  %v4563_v49 = vpack.c.bf16 %v2513_v17, %v2507_v14  ;;  %v3455_v11 = vand.u32 4294901760, %v3454_v8  ;;  %v3451_v13 = vand.u32 4294901760, %v3450_v10 }
 0x1a3   :  { %v4590_v27 = vpack.c.bf16 %v3460_v41, %v3454_v8 }
 0x1a4   :  { %4393 = vmatmul.mubr.f32.vlgmr.msra.gmra.mrb[6].mxu1 %v2983_v57  ;;  %v2515_v30 = vand.u32 4294901760, %v2514_v24  ;;  %v3456_v14 = vsub.f32 %v3454_v8, %v3455_v11  ;;  %v4602_v31 = vpack.c.bf16 %v3461_v12, %v3455_v11 }
 0x1a5   :  { %4396 = vmatpush3.msra.mxu1 %v4751_v7  ;;  %4397 = vmatprep.mubr.msk.f32.mxu1 %vm4705_vm2, %v4704_v0  ;;  %v3445_v7 = vand.u32 4294901760, %v3444_v9 }
 0x1a6   :  { %v4545_v33 = vpack.c.bf16 %v2515_v30, %v2509_v26  ;;  %v3457_v20 = vand.u32 4294901760, %v3456_v14  ;;  %v4587_v26 = vpack.c.bf16 %v3448_v2, %v5181_v53  ;;  %v4599_v30 = vpack.c.bf16 %v3449_v42, %v3443_v5 }
 0x1a7   :  { %v4581_v19 = vpack.c.bf16 %v3451_v13, %v3445_v7 }
 0x1a8   :  { %v4584_v24 = vpack.c.bf16 %v3463_v22, %v3457_v20 }
 0x1ac   :  { %4398 = vmatmul.mubr.f32.vlgmr.msra.gmra.mrb[6].mxu1 %v2983_v57 }
 0x227   :  { %v5119_v51 = vpop.f32.mrb[2].mxu1 }
 0x228   :  { %v4240_v52 = vpop.f32.mrb[3].mxu1 }
 0x253   :  { %v2423_v54 = vpop.f32.mrb[4].mxu1 }
 0x254   :  { %v2428_v55 = vsel %vm1027_vm4, %v2423_v54, 0  ;;  %v4303_v58 = vpop.f32.mrb[5].mxu1 }
 0x255   :  { %v5122_v60 = vand.u32 4294901760, %v2428_v55 }
 0x257   :  { %v2496_v61 = vsub.f32 %v2428_v55, %v5122_v60 }
 0x259   :  { %v2497_v62 = vand.u32 4294901760, %v2496_v61 }
 0x25b   :  { %v2498_v63 = vsub.f32 %v2496_v61, %v2497_v62 }
 0x25d   :  { %v2499_v1 = vand.u32 4294901760, %v2498_v63 }
 0x25f   :  { %4313 = vmatmul.mubr.f32.vlgmr.msra.gmra.mrb[2].mxu0 %v2499_v1 }
 0x260   :  { %4546 = vmatpush3.bf16.msra.mxu0 %v4545_v33  ;;  %4323 = vmatprep.mubr.msk.f32.mxu0 %vm4705_vm2, %v4704_v0 }
 0x261   :  { %4547 = vmatprep.subr.bf16.mxu0 %v4706_v34 }
 0x264   :  { %4549 = vmatpush3.bf16.msra.mxu0 %v4548_v44 }
 0x265   :  { %4550 = vmatprep.subr.bf16.mxu0 %v4706_v34 }
 0x267   :  { %4324 = vmatmul.mubr.f32.vlgmr.msra.gmra.mrb[2].mxu0 %v5122_v60 }
 0x268   :  { %4552 = vmatpush3.bf16.msra.mxu0 %v4551_v46  ;;  %4334 = vmatprep.mubr.msk.f32.mxu0 %vm4705_vm2, %v4704_v0 }
 0x269   :  { %4553 = vmatprep.subr.bf16.mxu0 %v4706_v34 }
 0x26c   :  { %4555 = vmatpush3.bf16.msra.mxu0 %v4554_v47 }
 0x26d   :  { %4556 = vmatprep.subr.bf16.mxu0 %v4706_v34 }
 0x26f   :  { %4335 = vmatmul.mubr.f32.vlgmr.msra.gmra.mrb[2].mxu0 %v2496_v61 }
 0x270   :  { %4558 = vmatpush3.bf16.msk.msra.mxu0 %vm5095_vm7, %v4707_v40  ;;  %4345 = vmatprep.mubr.msk.f32.mxu0 %vm4705_vm2, %v4704_v0 }
 0x271   :  { %4559 = vmatprep.subr.bf16.mxu0 %v4706_v34 }
 0x274   :  { %4561 = vmatpush3.bf16.msk.msra.mxu0 %vm5111_vm14, %v4707_v40 }
 0x275   :  { %4562 = vmatprep.subr.bf16.mxu0 %v4706_v34 }
 0x277   :  { %4346 = vmatmul.mubr.f32.vlgmr.msra.gmra.mrb[2].mxu0 %v2497_v62 }
 0x278   :  { %4564 = vmatpush3.bf16.msra.mxu0 %v4563_v49  ;;  %4356 = vmatprep.mubr.msk.f32.mxu0 %vm4705_vm2, %v4704_v0 }
 0x279   :  { %4565 = vmatprep.subr.bf16.mxu0 %v4706_v34 }
 0x27c   :  { %4567 = vmatpush3.bf16.msra.mxu0 %v4566_v50 }
 0x27d   :  { %4568 = vmatprep.subr.bf16.mxu0 %v4706_v34 }
 0x27f   :  { %4357 = vmatmul.mubr.f32.vlgmr.msra.gmra.mrb[2].mxu0 %v5122_v60  ;;  %v3359_v48 = vpop.f32.mrb[6].mxu1 }
 0x280   :  { %4570 = vmatpush3.bf16.msk.msra.mxu0 %vm5095_vm7, %v4707_v40  ;;  %v3364_v56 = vsel %vm1027_vm4, %v3359_v48, 0  ;;  %v4399_v6 = vpop.f32.mrb[7].mxu1  ;;  %4367 = vmatprep.mubr.msk.f32.mxu0 %vm4705_vm2, %v4704_v0  ;;  %vm5223_vm4 = vmpackc.low %vm5177_vm9, %vm5171_vm3  ;;  %vm3828_vm7 = vcmask 1045504  }
 0x281   :  { %v3431_v57 = vand.u32 4294901760, %v3364_v56  ;;  %4571 = vmatprep.subr.bf16.mxu0 %v4706_v34 }
 0x283   :  { %v3432_v59 = vsub.f32 %v3364_v56, %v3431_v57 }
 0x284   :  { %4573 = vmatpush3.bf16.msk.msra.mxu0 %vm5111_vm14, %v4707_v40 }
 0x285   :  { %v3433_v15 = vand.u32 4294901760, %v3432_v59  ;;  %4574 = vmatprep.subr.bf16.mxu0 %v4706_v34 }
 0x287   :  { %4368 = vmatmul.mubr.f32.vlgmr.msra.gmra.mrb[2].mxu0 %v5122_v60  ;;  %v3434_v17 = vsub.f32 %v3432_v59, %v3433_v15 }
 0x288   :  { %4576 = vmatpush3.bf16.msk.msra.mxu0 %vm5208_vm5, %v4707_v40  ;;  %4408 = vmatprep.mubr.msk.f32.mxu0 %vm4705_vm2, %v4704_v0 }
 0x289   :  { %4577 = vmatprep.subr.bf16.mxu0 %v4706_v34  ;;  %v3435_v23 = vand.u32 4294901760, %v3434_v17 }
 0x28c   :  { %4579 = vmatpush3.bf16.msk.msra.mxu0 %vm5223_vm4, %v4707_v40 }
 0x28d   :  { %4580 = vmatprep.subr.bf16.mxu0 %v4706_v34 }
 0x28f   :  { %4409 = vmatmul.mubr.f32.vlgmr.msra.gmra.mrb[2].mxu0 %v3435_v23 }
 0x290   :  { %4582 = vmatpush3.bf16.msra.mxu0 %v4581_v19  ;;  %4419 = vmatprep.mubr.msk.f32.mxu0 %vm4705_vm2, %v4704_v0 }
 0x291   :  { %4583 = vmatprep.subr.bf16.mxu0 %v4706_v34 }
 0x294   :  { %4585 = vmatpush3.bf16.msra.mxu0 %v4584_v24 }
 0x295   :  { %4586 = vmatprep.subr.bf16.mxu0 %v4706_v34 }
 0x297   :  { %4420 = vmatmul.mubr.f32.vlgmr.msra.gmra.mrb[2].mxu0 %v3431_v57 }
 0x298   :  { %4588 = vmatpush3.bf16.msra.mxu0 %v4587_v26  ;;  %4430 = vmatprep.mubr.msk.f32.mxu0 %vm4705_vm2, %v4704_v0 }
 0x299   :  { %4589 = vmatprep.subr.bf16.mxu0 %v4706_v34 }
 0x29c   :  { %4591 = vmatpush3.bf16.msra.mxu0 %v4590_v27 }
 0x29d   :  { %4592 = vmatprep.subr.bf16.mxu0 %v4706_v34 }
 0x29f   :  { %4431 = vmatmul.mubr.f32.vlgmr.msra.gmra.mrb[2].mxu0 %v3432_v59 }
 0x2a0   :  { %4594 = vmatpush3.bf16.msk.msra.mxu0 %vm5208_vm5, %v4707_v40  ;;  %4441 = vmatprep.mubr.msk.f32.mxu0 %vm4705_vm2, %v4704_v0 }
 0x2a1   :  { %4595 = vmatprep.subr.bf16.mxu0 %v4706_v34 }
 0x2a4   :  { %4597 = vmatpush3.bf16.msk.msra.mxu0 %vm5223_vm4, %v4707_v40 }
 0x2a5   :  { %4598 = vmatprep.subr.bf16.mxu0 %v4706_v34 }
 0x2a7   :  { %4442 = vmatmul.mubr.f32.vlgmr.msra.gmra.mrb[2].mxu0 %v3433_v15 }
 0x2a8   :  { %4600 = vmatpush3.bf16.msra.mxu0 %v4599_v30  ;;  %4452 = vmatprep.mubr.msk.f32.mxu0 %vm4705_vm2, %v4704_v0 }
 0x2a9   :  { %4601 = vmatprep.subr.bf16.mxu0 %v4706_v34 }
 0x2ac   :  { %4603 = vmatpush3.bf16.msra.mxu0 %v4602_v31 }
 0x2ad   :  { %4604 = vmatprep.subr.bf16.mxu0 %v4706_v34 }
 0x2af   :  { %4453 = vmatmul.mubr.f32.vlgmr.msra.gmra.mrb[2].mxu0 %v3431_v57 }
 0x2b0   :  { %4606 = vmatpush3.bf16.msk.msra.mxu0 %vm5208_vm5, %v4707_v40  ;;  %4463 = vmatprep.mubr.msk.f32.mxu0 %vm4705_vm2, %v4704_v0  ;;  %v3843_v0 = vld [vmem:[%s5279_s2] sm:$0x3f] }
 0x2b1   :  { %4607 = vmatprep.subr.bf16.mxu0 %v4706_v34  ;;  %3846 = vperm.xlu1 %4700, %v3843_v0   ;;  %v3850_v34 = vld [vmem:[%s5280_s3] sm:$0x3f] }
 0x2b4   :  { %4609 = vmatpush3.bf16.msk.msra.mxu0 %vm5223_vm4, %v4707_v40 }
 0x2b5   :  { %3853 = vperm.xlu1 %4700, %v3850_v34  }
 0x2b7   :  { %4464 = vmatmul.mubr.f32.vlgmr.msra.gmra.mrb[2].mxu0 %v3431_v57 }
 0x330   :  { %v3847_v55 = vpop.permute.xlu1 %3846 }
 0x334   :  { %v3854_v62 = vpop.permute.xlu1 %3853 }
 0x38a   :  { %v3823_v32 = vpop.f32.mrb[2].mxu0 }
 0x38b   :  { %v4610_v33 = vadd.f32 %v3823_v32, %v5119_v51  ;;  %v4465_v38 = vpop.f32.mrb[3].mxu0 }
 0x38d   :  { %v3829_v39 = vsel %vm3828_vm7, %v4610_v33, 0.0 }
 0x38e   :  { %3830 = vadd.xlane.f32.xlu0 %v3829_v39 }
 0x41b   :  { %v3831_v40 = vpop.xlane.xlu0 %3830 }
 0x41c   :  { %v3832_v44 = vmul.f32 0.015151516, %v3831_v40 }
 0x41e   :  { %v3833_v46 = vsub.f32 %v4610_v33, %v3832_v44 }
 0x420   :  { %v3834_v47 = vsel %vm72_vm13, %v3833_v46, 0.0 }
 0x421   :  { %v3835_v49 = vmul.f32 %v3834_v47, %v3834_v47 }
 0x423   :  { %v3836_v50 = vsel %vm3828_vm7, %v3835_v49, 0.0 }
 0x424   :  { %3837 = vadd.xlane.f32.xlu0 %v3836_v50 }
 0x4b1   :  { %v3838_v51 = vpop.xlane.xlu0 %3837 }
 0x4b2   :  { %v3839_v52 = vmul.f32 0.015151516, %v3838_v51 }
 0x4b4   :  { %v3840_v54 = vadd.f32 1e-05, %v3839_v52 }
 0x4b6   :  { %4702 = vrsqrt.f32 %v3840_v54 }
 0x4c0   :  { %v4703_v58 = vpop.eup %4702 }
 0x4c1   :  { %v3842_v60 = vmul.f32 %v4703_v58, %v3834_v47 }
 0x4c3   :  { %v3849_v61 = vmul.f32 %v3847_v55, %v3842_v60 }
 0x4c5   :  { %v3856_v63 = vadd.f32 %v3854_v62, %v3849_v61 }
 0x4c7   :  { %v3857_v1 = vmax.f32 %v3856_v63, 0.0 }
 0x4c9   :  { %3858 = vst [vmem:[%s5281_s4] sm:$0x3f] %v3857_v1 }

</bundles_post_ra>
